<compile_context>
chip_gen: v7x
topology: tpu7x:2x2x1
jax: 0.10.0
libtpu: 0.0.40
codegen_flags: <defaults>
</compile_context>

<pallas_src>
import math

import jax
import jax.numpy as jnp
from jax import lax
from jax.experimental import pallas as pl
from jax.experimental.pallas import tpu as pltpu


def _round_up(x, m):
    return (x + m - 1) // m * m


def _sublane_multiple(dtype):
    # Second-to-last block dim must be a multiple of 8 (4-byte), 16 (2-byte),
    # 32 (1-byte) for Mosaic-friendly layouts.
    return max(8, 32 // jnp.dtype(dtype).itemsize)


def _vmem_limit_bytes():
    try:
        phys = int(pltpu.get_tpu_info().vmem_capacity_bytes)
    except Exception:
        phys = 64 * 1024 * 1024  # v7x per-TensorCore worst case
    # ~48 MiB on v7x (64 MiB physical), ~96 MiB on v5e/v6e (128 MiB physical)
    return max(32 * 1024 * 1024, min(phys * 3 // 4, 100 * 1024 * 1024))


# x tile (tm, tk) . w tile (tn, tk), contracting the last dim of both -> (tm, tn)
_CONTRACT_LAST = (((1,), (1,)), ((), ()))


def _mm_kernel_single_k(x_ref, w_ref, o_ref):
    # One K step: write the dot straight to the output tile (no init/copy).
    o_ref[...] = lax.dot_general(
        x_ref[...], w_ref[...], _CONTRACT_LAST,
        preferred_element_type=jnp.float32,
    ).astype(o_ref.dtype)


def _mm_kernel_acc_out(x_ref, w_ref, o_ref):
    # f32 output: the (i, j) output tile is resident across the k axis
    # (its index map ignores k), so accumulate into it directly — no scratch.
    @pl.when(pl.program_id(2) == 0)
    def _init():
        o_ref[...] = jnp.zeros_like(o_ref)

    o_ref[...] += lax.dot_general(
        x_ref[...], w_ref[...], _CONTRACT_LAST,
        preferred_element_type=jnp.float32,
    )


def _mm_kernel_acc_scratch(x_ref, w_ref, o_ref, acc_ref):
    # Non-f32 output: accumulate in an f32 VMEM scratch, cast on the last step.
    @pl.when(pl.program_id(2) == 0)
    def _init():
        acc_ref[...] = jnp.zeros_like(acc_ref)

    acc_ref[...] += lax.dot_general(
        x_ref[...], w_ref[...], _CONTRACT_LAST,
        preferred_element_type=jnp.float32,
    )

    @pl.when(pl.program_id(2) == pl.num_programs(2) - 1)
    def _store():
        o_ref[...] = acc_ref[...].astype(o_ref.dtype)


def custom_linear(x, weight, *, tm=512, tn=512, tk=1024,
                  compute_dtype=None, out_dtype=None, force_pallas=False):
    """y = x @ weight.T.  x: (..., in_features), weight: (out_features, in_features)."""
    *lead, K = x.shape
    N, w_in = weight.shape
    assert w_in == K, (w_in, K)
    M = math.prod(lead) if lead else 1

    out_dtype = jnp.dtype(out_dtype if out_dtype is not None else x.dtype)
    compute_dtype = jnp.dtype(compute_dtype if compute_dtype is not None else x.dtype)

    # Tiny problems: pallas_call + per-grid-step overhead dominates — let plain
    # XLA handle them unless explicitly forced through the kernel.
    if not force_pallas and 2 * M * N * K < (1 << 24):
        y = jnp.dot(x.reshape(M, K).astype(compute_dtype),
                    weight.astype(compute_dtype).T,
                    preferred_element_type=jnp.float32)
        return y.astype(out_dtype).reshape(*lead, N)

    x2d = x.reshape(M, K)
    w = weight  # stays (N, K): no per-call transpose / HBM copy
    if x2d.dtype != compute_dtype:
        x2d = x2d.astype(compute_dtype)
    if w.dtype != compute_dtype:
        w = w.astype(compute_dtype)

    # --- tile selection (dtype-dependent sublane alignment) ------------------
    sub_m = max(_sublane_multiple(compute_dtype), _sublane_multiple(out_dtype))
    tm = _round_up(min(max(tm, sub_m), _round_up(M, sub_m)), sub_m)
    tn = _round_up(min(max(tn, 128), _round_up(N, 128)), 128)
    tk = _round_up(min(max(tk, 128), _round_up(K, 128)), 128)

    in_size = jnp.dtype(compute_dtype).itemsize
    out_size = out_dtype.itemsize
    vmem_limit = _vmem_limit_bytes()
    budget = int(vmem_limit * 0.7)

    def live_bytes(tm_, tn_, tk_):
        # double-buffered input/output tiles + f32 accumulator headroom
        return (2 * (tm_ * tk_ + tn_ * tk_) * in_size
                + 2 * tm_ * tn_ * out_size + tm_ * tn_ * 4)

    for _ in range(16):  # shrink (tk first, then tm/tn) until it fits
        if live_bytes(tm, tn, tk) <= budget:
            break
        if tk > 128:
            tk = max(128, _round_up(tk // 2, 128))
        elif tm >= tn and tm > sub_m:
            tm = max(sub_m, _round_up(tm // 2, sub_m))
        elif tn > 128:
            tn = max(128, _round_up(tn // 2, 128))
        elif tm > sub_m:
            tm = max(sub_m, _round_up(tm // 2, sub_m))
        else:
            break

    # v7x megacore: keep >=2 blocks on a parallel axis so both TCs get work.
    if pl.cdiv(M, tm) * pl.cdiv(N, tn) == 1:
        if N > 128:
            tn = max(128, _round_up((N + 1) // 2, 128))
        elif M > sub_m:
            tm = max(sub_m, _round_up((M + 1) // 2, sub_m))

    # --- K padding: only the reduction axis needs zero-fill ------------------
    Kp = _round_up(K, tk)
    if Kp != K:
        x2d = jnp.pad(x2d, ((0, 0), (0, Kp - K)))
        w = jnp.pad(w, ((0, 0), (0, Kp - K)))

    grid = (pl.cdiv(M, tm), pl.cdiv(N, tn), Kp // tk)  # reduction axis last

    if grid[2] == 1:
        kernel, scratch = _mm_kernel_single_k, []
    elif out_dtype == jnp.float32:
        kernel, scratch = _mm_kernel_acc_out, []
    else:
        kernel, scratch = _mm_kernel_acc_scratch, [pltpu.VMEM((tm, tn), jnp.float32)]

    cost = pl.CostEstimate(
        flops=2 * M * N * K,
        transcendentals=0,
        # actual tiled traffic: x re-read per N block, w re-read per M block
        bytes_accessed=(M * K * grid[1] + K * N * grid[0]) * in_size
                       + M * N * out_size,
    )

    out = pl.pallas_call(
        kernel,
        out_shape=jax.ShapeDtypeStruct((M, N), out_dtype),
        grid_spec=pltpu.PrefetchScalarGridSpec(
            num_scalar_prefetch=0,
            grid=grid,
            in_specs=[
                pl.BlockSpec((tm, tk), lambda i, j, k: (i, k)),
                pl.BlockSpec((tn, tk), lambda i, j, k: (j, k)),
            ],
            out_specs=pl.BlockSpec((tm, tn), lambda i, j, k: (i, j)),
            scratch_shapes=scratch,
        ),
        compiler_params=pltpu.CompilerParams(
            dimension_semantics=("parallel", "parallel", "arbitrary"),
            vmem_limit_bytes=vmem_limit,
        ),
        cost_estimate=cost,
    )(x2d, w)

    return out.reshape(*lead, N)


def init_weight(key, in_features, out_features, dtype=jnp.float32):
    # Matches nn.init.trunc_normal_(mean=0, std=std, a=-3*std, b=3*std)
    std = (2.0 / (in_features + out_features)) ** 0.5
    w = jax.random.truncated_normal(
        key, -3.0, 3.0, (out_features, in_features), dtype=jnp.float32
    ) * std
    return w.astype(dtype)


if __name__ == "__main__":
    key = jax.random.PRNGKey(0)
    k_x1, k_w1, k_x2, k_w2, k_x3, k_w3 = jax.random.split(key, 6)

    # Case 1: tile-aligned shapes, single K step, f32 direct-write path.
    batch, seq, in_features, out_features = 2, 64, 256, 512
    x = jax.random.normal(k_x1, (batch, seq, in_features), dtype=jnp.float32)
    weight = init_weight(k_w1, in_features, out_features)
    y = jax.block_until_ready(custom_linear(x, weight))
    y_ref = jnp.einsum("bsk,nk->bsn", x, weight, precision=lax.Precision.HIGHEST)
    assert y.shape == (batch, seq, out_features)
    assert jnp.allclose(y, y_ref, atol=1e-2, rtol=1e-2)

    # Case 2: ragged (non-multiple-of-128) shapes — exercises K-only zero
    # padding + masked partial M/N edge blocks (force_pallas skips the XLA gate).
    b2, s2, in2, out2 = 2, 8, 96, 72
    x2 = jax.random.normal(k_x2, (b2, s2, in2), dtype=jnp.float32)
    w2 = init_weight(k_w2, in2, out2)
    y2 = jax.block_until_ready(custom_linear(x2, w2, force_pallas=True))
    y2_ref = jnp.einsum("bsk,nk->bsn", x2, w2, precision=lax.Precision.HIGHEST)
    assert y2.shape == (b2, s2, out2)
    assert jnp.allclose(y2, y2_ref, atol=1e-2, rtol=1e-2)

    # Case 3: multiple K steps, f32 accumulate-into-resident-output path.
    b3, s3, in3, out3 = 2, 16, 256, 192
    x3 = jax.random.normal(k_x3, (b3, s3, in3), dtype=jnp.float32)
    w3 = init_weight(k_w3, in3, out3)
    y3 = jax.block_until_ready(custom_linear(x3, w3, tk=128, force_pallas=True))
    y3_ref = jnp.einsum("bsk,nk->bsn", x3, w3, precision=lax.Precision.HIGHEST)
    assert y3.shape == (b3, s3, out3)
    assert jnp.allclose(y3, y3_ref, atol=1e-2, rtol=1e-2)

    # Case 4: opt-in bf16 MXU path with bf16 output — multi-K f32-scratch path
    # and 16-sublane tile alignment (looser numeric tolerance, by design).
    y4 = jax.block_until_ready(
        custom_linear(x3, w3, tk=128, force_pallas=True,
                      compute_dtype=jnp.bfloat16, out_dtype=jnp.bfloat16))
    assert y4.shape == (b3, s3, out3)
    assert jnp.allclose(y4.astype(jnp.float32), y3_ref, atol=1e-1, rtol=1e-1)

    print("KERNEL_OK")
</pallas_src>

<mosaic_0001>
module attributes {stable_mosaic.version = 11 : i64} {
  func.func @_mm_kernel_single_k(%arg0: i32, %arg1: i32, %arg2: i32, %arg3: memref<128x256xf32, #tpu.memory_space<vmem>>, %arg4: memref<256x256xf32, #tpu.memory_space<vmem>>, %arg5: memref<128x256xf32, #tpu.memory_space<vmem>>) attributes {dimension_semantics = [#tpu.dimension_semantics<parallel>, #tpu.dimension_semantics<parallel>, #tpu.dimension_semantics<arbitrary>], iteration_bounds = array<i64: 1, 2, 1>, scalar_prefetch = 0 : i64, scratch_operands = 0 : i64, tpu.core_type = #tpu.core_type<tc>, window_params = [{transform_indices = @transform_0, window_bounds = array<i64: 128, 256>}, {transform_indices = @transform_1, window_bounds = array<i64: 256, 256>}, {transform_indices = @transform_2, window_bounds = array<i64: 128, 256>}]} {
    %c0 = arith.constant 0 : index
    %c0_0 = arith.constant 0 : index
    %0 = vector.load %arg3[%c0, %c0_0] : memref<128x256xf32, #tpu.memory_space<vmem>>, vector<128x256xf32>
    %c0_1 = arith.constant 0 : index
    %c0_2 = arith.constant 0 : index
    %1 = vector.load %arg4[%c0_1, %c0_2] : memref<256x256xf32, #tpu.memory_space<vmem>>, vector<256x256xf32>
    %cst = arith.constant dense<0.000000e+00> : vector<128x256xf32>
    %2 = tpu.matmul %0, %1, %cst {dimension_numbers = #tpu.dot_dimension_numbers<[1], [1], [0], [0], [0, 0, 1, 0], [], []>} : vector<128x256xf32>, vector<256x256xf32>, vector<128x256xf32> -> vector<128x256xf32>
    %c0_3 = arith.constant 0 : index
    %c0_4 = arith.constant 0 : index
    %3 = vector.load %arg5[%c0_3, %c0_4] : memref<128x256xf32, #tpu.memory_space<vmem>>, vector<128x256xf32>
    tpu.vector_store %arg5[%c0_3, %c0_4], %2 {strides = array<i32>} : memref<128x256xf32, #tpu.memory_space<vmem>>, vector<128x256xf32>,
    return
  }
  func.func @transform_0(%arg0: i32, %arg1: i32, %arg2: i32) -> (i32, i32) {
    %c0_i32 = arith.constant 0 : i32
    return %arg0, %arg2 : i32, i32
  }
  func.func @transform_1(%arg0: i32, %arg1: i32, %arg2: i32) -> (i32, i32) {
    %c0_i32 = arith.constant 0 : i32
    return %arg1, %arg2 : i32, i32
  }
  func.func @transform_2(%arg0: i32, %arg1: i32, %arg2: i32) -> (i32, i32) {
    %c0_i32 = arith.constant 0 : i32
    return %arg0, %arg1 : i32, i32
  }
}

</mosaic_0001>

<bundles_post_ra>
// kernel: tpu_custom_call.1
= control target key start
LH: loop header
LB: loop body
LE: loop exit
PB: predicated region body
PF: predicated region fallthrough
CT: control target
= control target key end

     0   :  { %7 = vsyncpa [#allocation3], 0  ;;  %s1326_s0 = inlined_call_operand.hbm [shape: f32[128,256], index: 0, kind: input, shape index: {}]   ;;  %s1327_s1 = inlined_call_operand.hbm [shape: f32[512,256], index: 1, kind: input, shape index: {}]   ;;  %s1328_s2 = inlined_call_operand.hbm [shape: f32[128,512], index: 2, kind: output, shape index: {}]  }
   0x1   :  { %8 = vsyncpa [#allocation6], 0 }
   0x2   :  { %10 = vsyncpa [#allocation6 + $0x1], 0 }
   0x3   :  { %11 = vsyncpa [#allocation4], 0 }
   0x4   :  { %13 = vsyncpa [#allocation4 + $0x1], 0  ;;  %s999_s9 = smov 0   ;;  %s1001_s10 = smov 0  }
   0x5   :  { %s1003_s11 = smov 0   ;;  %s1005_s12 = smov 0  }
   0x6   :  { %s1007_s13 = smov 0   ;;  %s1009_s14 = smov 0  }
   0x7 LB: > { %s635_s15 = sadd.s32 4294967295, %s974_s14   ;;  %s636_s16 = sadd.s32 4294967294, %s974_s14   ;;  %s974_s14 = sphi %s1009_s14, %s19_s14   ;;  %s970_s13 = sphi %s1007_s13, %s1352_s13   ;;  %s966_s12 = sphi %s1005_s12, %s1351_s12   ;;  %s962_s11 = sphi %s1003_s11, %s1350_s11   ;;  %s958_s10 = sphi %s1001_s10, %s1349_s10   ;;  %s954_s9 = sphi %s999_s9, %s1348_s9  }
   0x8   : > { %p88_p0 = scmp.ne.s32.totalorder %s958_s10, %s954_s9  ;;  %p1033_p1 = scmp.eq.s32.totalorder %s635_s15, 0 }
   0x9   : > { %p1037_p2 = scmp.eq.s32.totalorder %s635_s15, 1  ;;  %p120_p3 = scmp.eq.s32.totalorder %s636_s16, 1 }
   0xa   : > { %s1333_s17 = scalar_select %p1033_p1, 1, 0 }
   0xb   : > { %s1334_s18 = scalar_select %p1037_p2, 1, 0 }
   0xc   : > { %p1043_p4 = por %p1033_p1, %p88_p0  ;;  %p637_p5 = scmp.ge.s32.totalorder %s974_s14, 1 }
   0xd   : > { %p1048_p6 = por %p120_p3, %p88_p0  ;;  %p127_p7 = scmp.lt.s32.totalorder %s974_s14, 3 }
   0xe   : > { %s1335_s19 = scalar_select %p1043_p4, 1, 0 }
   0xf   : > { %s1336_s20 = scalar_select %p1048_p6, 1, 0 }
  0x10   : > { %p1053_p8 = pnand %p637_p5, %p127_p7  ;;  %s976_s22 = smov [#allocation2]  }
  0x11   : > { %s145_s23 = sshll.u32 %s976_s22, 4  ;;  %s34_s25 = sadd.s32 1, %s970_s13  ;;  %s146_s23 = int_to_ptr.vmem [resolvable:$true] %s145_s23 }
  0x12   : > { %s1337_s21 = scalar_select %p1053_p8, 1, 0 }
  0x13   : > { %p760_p9 = pneg %p1053_p8  ;;  %s830_s28 = scalar_lea.hbm %s1326_s0, 4096 }
  0x14   : > { %p831_p12 = scmp.ne.s32.totalorder %s1326_s0, %s830_s28  ;;  %p837_p5 = scmp.lt.u32.totalorder %s830_s28, %s1326_s0 }
  0x15   : > { %p1062_p11 = pnand %p760_p9, %p1033_p1 }
  0x17   : > { %p832_p13 = pneg %p1062_p11 }
  0x19   : > { %p833_p0 = pnand %p832_p13, %p831_p12 }
  0x1b   : > { %p834_p3 = pneg %p833_p0 }
  0x1d   : > { %p839_p7 = pnand %p837_p5, %p834_p3 }
  0x1f   : > { %842 = shalt.err (!%p839_p7)
}
  0x20   : > { %s843_s5 = scalar_lea.vmem %s146_s23, 4096  ;;  %p851_p4 = scmp.lt.s32.totalorder %s146_s23, %s146_s23 }
  0x21   : > { %p844_p9 = scmp.ne.s32.totalorder %s146_s23, %s843_s5  ;;  %p852_p1 = scmp.lt.s32.totalorder %s843_s5, %s843_s5 }
  0x23   : > { %p846_p10 = pnand %p844_p9, %p832_p13  ;;  %p853_p8 = por %p852_p1, %p851_p4 }
  0x25   : > { %p847_p6 = pneg %p846_p10 }
  0x27   : > { %p854_p2 = pnand %p853_p8, %p847_p6 }
  0x29   : > { %857 = shalt.err (!%p854_p2)
}
  0x2a   : > { %s977_s6 = smov 256   ;;  %s978_s7 = smov 16  }
  0x2b   : > { %763 = dma.hbm_to_vmem [thread:$0]  (!%p1062_p11), %s1326_s0, 4096, %s146_s23, [#allocation3], %s977_s6, %s977_s6, %s978_s7  }
  0x2c   : > { %p36_p1 = scmp.ge.s32.totalorder %s34_s25, 2  ;;  %s75_s16 = sadd.s32 1, %s962_s11 }
  0x2d   : > { %p82_p2 = scmp.ne.s32.totalorder %s962_s11, %s958_s10  ;;  %p83_p4 = scmp.eq.s32.totalorder %s974_s14, 0 }
  0x2e   : > { %s1354_s25 = smov (%p36_p1, %s34_s25), 0  ;;  %p1340_p8 = scmp.ne.s32.totalorder %s1334_s18, 0 }
  0x2f   : > { %p1092_p6 = por %p83_p4, %p82_p2  ;;  %s70_s26 = ssub.s32 %s970_s13, %s1354_s25 }
  0x30   : > { %p1098_p10 = por %p1340_p8, %p82_p2  ;;  %p773_p12 = scmp.lt.s32.totalorder %s974_s14, 2 }
  0x31   : > { %p73_p11 = scmp.eq.s32.totalorder %s70_s26, 0  ;;  %s159_s23 = sand.u32 1, %s962_s11  }
  0x32   : > { %s640_s27 = sshll.u32 %s159_s23, 9  ;;  %s654_s29 = sshll.u32 %s970_s13, 13 }
  0x33   : > { %s1107_s28 = scalar_select %p73_p11, %s962_s11, %s75_s16  }
  0x34   : > { %s1113_s4 = scalar_lea.hbm %s1327_s1, %s654_s29  ;;  %s163_s18 = scalar_lea.vmem [#allocation5], %s640_s27 }
  0x35   : > { %s173_s5 = sshll.u32 %s163_s18, 4  ;;  %p1119_p13 = pnand %p773_p12, %p1092_p6  ;;  %s1115_s5 = int_to_ptr.vmem [resolvable:$true] %s173_s5 }
  0x36   : > { %s1123_s15 = scalar_lea.sflag [#allocation6], %s159_s23  ;;  %s858_s16 = scalar_lea.hbm %s1113_s4, 8192 }
  0x37   : > { %p859_p0 = scmp.ne.s32.totalorder %s1113_s4, %s858_s16  ;;  %p860_p3 = pneg %p1119_p13 }
  0x38   : > { %s863_s22 = scalar_lea.hbm %s1327_s1, 16384  ;;  %p864_p9 = scmp.lt.u32.totalorder %s1113_s4, %s1327_s1 }
  0x39   : > { %p861_p5 = pnand %p860_p3, %p859_p0  ;;  %p865_p1 = scmp.lt.u32.totalorder %s863_s22, %s858_s16 }
  0x3a   : > { %p867_p4 = scmp.lt.u32.totalorder %s858_s16, %s1113_s4 }
  0x3b   : > { %p862_p7 = pneg %p861_p5  ;;  %p866_p2 = por %p865_p1, %p864_p9 }
  0x3d   : > { %p868_p6 = por %p867_p4, %p866_p2 }
  0x3f   : > { %p869_p8 = pnand %p868_p6, %p862_p7 }
  0x41   : > { %872 = shalt.err (!%p869_p8)
}
  0x42   : > { %s873_s23 = scalar_lea.vmem %s1115_s5, 8192  ;;  %s979_s3 = smov [#allocation5]  }
  0x43   : > { %p874_p12 = scmp.ne.s32.totalorder %s1115_s5, %s873_s23  ;;  %s878_s18 = sshll.u32 %s979_s3, 4  ;;  %s879_s18 = int_to_ptr.vmem [resolvable:$false] %s878_s18 }
  0x44   : > { %s880_s26 = scalar_lea.vmem %s879_s18, 16384  ;;  %p881_p5 = scmp.lt.s32.totalorder %s1115_s5, %s879_s18 }
  0x45   : > { %p876_p11 = pnand %p874_p12, %p860_p3  ;;  %p882_p9 = scmp.lt.s32.totalorder %s880_s26, %s873_s23 }
  0x47   : > { %p877_p0 = pneg %p876_p11  ;;  %p883_p1 = por %p882_p9, %p881_p5 }
  0x49   : > { %p884_p2 = pnand %p883_p1, %p877_p0 }
  0x4b   : > { %887 = shalt.err (!%p884_p2)
}
  0x4c   : > { %767 = dma.hbm_to_vmem [thread:$0]  (!%p1119_p13), %s1113_s4, 8192, %s1115_s5, %s1123_s15, %s977_s6, %s977_s6, %s978_s7  }
  0x4d   : > { %p1343_p3 = scmp.ne.s32.totalorder %s1337_s21, 0 }
  0x4e   : > { %p1344_p7 = scmp.ne.s32.totalorder (!%p1343_p3), %s1333_s17, 0 }
  0x4f   : > { %185 = sbr.rel (%p1343_p3) target bundleno = 479 (0x1df), region = 28 }
  0x56   : > { %941 = dma.done.wait (%p1344_p7), [#allocation3], 4096  }
  0x57   : > { %943 = vsyncadd (%p1344_p7), [#allocation3], 4294963200  ;;  %s1161_s16 = sand.u32 1, %s958_s10   ;;  %p1345_p13 = scmp.ne.s32.totalorder %s1335_s19, 0 }
  0x58   : > { %s646_s8 = sshll.u32 %s1161_s16, 9  ;;  %s192_s27 = scalar_lea.sflag [#allocation6], %s1161_s16 }
  0x59   : > { %s1165_s22 = scalar_lea.vmem [#allocation5], %s646_s8 }
  0x5a   : > { %945 = dma.done.wait (%p1345_p13), %s192_s27, 8192  }
  0x5b   : > { %947 = vsyncadd (%p1345_p13), %s192_s27, 4294959104  ;;  %v255_v0 = vld [vmem:[%s1165_s22 + $0x8] sm:$0xff]  ;;  %v257_v1 = vld [vmem:[%s1165_s22 + $0x18] sm:$0xff]  ;;  %s647_s17 = sshll.u32 %s1161_s16, 8  ;;  %s655_s21 = sshll.u32 %s966_s12, 8 }
  0x5c   : > { %v254_v2 = vld [vmem:[%s1165_s22] sm:$0xff]  ;;  %v656_v3 = vpack.c.bf16 %v257_v1, %v255_v0  ;;  %v256_v4 = vld [vmem:[%s1165_s22 + $0x10] sm:$0xff]  ;;  %v259_v5 = vld [vmem:[%s1165_s22 + $0x28] sm:$0xff]  ;;  %s1236_s19 = scalar_lea.vmem [#allocation7], %s647_s17  ;;  %s1271_s5 = scalar_lea.hbm %s1328_s2, %s655_s21 }
  0x5d   : > { %v261_v6 = vld [vmem:[%s1165_s22 + $0x38] sm:$0xff]  ;;  %v658_v7 = vpack.c.bf16 %v256_v4, %v254_v2  ;;  %v258_v9 = vld [vmem:[%s1165_s22 + $0x20] sm:$0xff]  ;;  %v260_v10 = vld [vmem:[%s1165_s22 + $0x30] sm:$0xff]  ;;  %s528_s6 = sshll.u32 %s1236_s19, 4  ;;  %s512_s12 = scalar_lea.sflag [#allocation4], %s1161_s16  ;;  %s1273_s6 = int_to_ptr.vmem [resolvable:$true] %s528_s6 }
  0x5e   : > { %v660_v8 = vpack.c.bf16 %v261_v6, %v259_v5  ;;  %657 = vmatprep.subr.bf16.mxu0 %v656_v3  ;;  %720 = vmatprep.subr.bf16.mxu1 %v656_v3  ;;  %v263_v11 = vld [vmem:[%s1165_s22 + $0x48] sm:$0xff]  ;;  %v265_v12 = vld [vmem:[%s1165_s22 + $0x58] sm:$0xff]  ;;  %v662_v13 = vpack.c.bf16 %v260_v10, %v258_v9  ;;  %v262_v15 = vld [vmem:[%s1165_s22 + $0x40] sm:$0xff]  ;;  %s888_s15 = scalar_lea.vmem %s1273_s6, 4096  ;;  %s980_s29 = smov [#allocation7]  }
  0x5f   : > { %659 = vmatpush1.bf16.xpose.msra.mxu0 %v658_v7  ;;  %736 = vmatpush1.bf16.xpose.msra.mxu1 %v658_v7  ;;  %v664_v14 = vpack.c.bf16 %v265_v12, %v263_v11  ;;  %v264_v16 = vld [vmem:[%s1165_s22 + $0x50] sm:$0xff]  ;;  %v267_v17 = vld [vmem:[%s1165_s22 + $0x68] sm:$0xff]  ;;  %v269_v18 = vld [vmem:[%s1165_s22 + $0x78] sm:$0xff]  ;;  %p889_p4 = scmp.ne.s32.totalorder %s1273_s6, %s888_s15  ;;  %s892_s30 = sshll.u32 %s980_s29, 4  ;;  %s893_s30 = int_to_ptr.vmem [resolvable:$false] %s892_s30 }
  0x60   : > { %661 = vmatprep.subr.bf16.mxu0 %v660_v8  ;;  %721 = vmatprep.subr.bf16.mxu1 %v660_v8  ;;  %v666_v19 = vpack.c.bf16 %v264_v16, %v262_v15  ;;  %v668_v20 = vpack.c.bf16 %v269_v18, %v267_v17  ;;  %v266_v21 = vld [vmem:[%s1165_s22 + $0x60] sm:$0xff]  ;;  %v268_v22 = vld [vmem:[%s1165_s22 + $0x70] sm:$0xff]  ;;  %v223_v23 = vld [vmem:[#allocation2 + $0x8] sm:$0xff]  ;;  %s894_s23 = scalar_lea.vmem %s893_s30, 8192  ;;  %p895_p12 = scmp.lt.s32.totalorder %s1273_s6, %s893_s30 }
  0x61   : > { %v239_v24 = vld [vmem:[#allocation2 + $0x88] sm:$0xff]  ;;  %v273_v26 = vld [vmem:[%s1165_s22 + $0x98] sm:$0xff]  ;;  %382 = vmatprep.mubr.f32.mxu0 %v223_v23  ;;  %v670_v27 = vpack.c.bf16 %v268_v22, %v266_v21  ;;  %v270_v29 = vld [vmem:[%s1165_s22 + $0x80] sm:$0xff]  ;;  %p890_p6 = pnand %p889_p4, %p1098_p10  ;;  %p896_p11 = scmp.lt.s32.totalorder %s894_s23, %s888_s15 }
  0x62   : > { %v271_v25 = vld [vmem:[%s1165_s22 + $0x88] sm:$0xff]  ;;  %430 = vmatprep.mubr.f32.mxu1 %v239_v24  ;;  %v272_v30 = vld [vmem:[%s1165_s22 + $0x90] sm:$0xff]  ;;  %v277_v32 = vld [vmem:[%s1165_s22 + $0xb8] sm:$0xff] }
  0x63   : > { %v672_v28 = vpack.c.bf16 %v273_v26, %v271_v25  ;;  %v275_v31 = vld [vmem:[%s1165_s22 + $0xa8] sm:$0xff]  ;;  %v674_v33 = vpack.c.bf16 %v272_v30, %v270_v29  ;;  %v274_v35 = vld [vmem:[%s1165_s22 + $0xa0] sm:$0xff]  ;;  %v276_v36 = vld [vmem:[%s1165_s22 + $0xb0] sm:$0xff]  ;;  %p891_p8 = pneg %p890_p6  ;;  %p897_p0 = por %p896_p11, %p895_p12 }
  0x64   : > { %v676_v34 = vpack.c.bf16 %v277_v32, %v275_v31  ;;  %v279_v37 = vld [vmem:[%s1165_s22 + $0xc8] sm:$0xff]  ;;  %v281_v38 = vld [vmem:[%s1165_s22 + $0xd8] sm:$0xff]  ;;  %v678_v39 = vpack.c.bf16 %v276_v36, %v274_v35  ;;  %v278_v41 = vld [vmem:[%s1165_s22 + $0xc0] sm:$0xff] }
  0x65   : > { %v680_v40 = vpack.c.bf16 %v281_v38, %v279_v37  ;;  %v280_v42 = vld [vmem:[%s1165_s22 + $0xd0] sm:$0xff]  ;;  %v283_v43 = vld [vmem:[%s1165_s22 + $0xe8] sm:$0xff]  ;;  %v285_v44 = vld [vmem:[%s1165_s22 + $0xf8] sm:$0xff]  ;;  %p898_p5 = pnand %p897_p0, %p891_p8 }
  0x66   : > { %v682_v45 = vpack.c.bf16 %v280_v42, %v278_v41  ;;  %v684_v46 = vpack.c.bf16 %v285_v44, %v283_v43  ;;  %v282_v47 = vld [vmem:[%s1165_s22 + $0xe0] sm:$0xff]  ;;  %v284_v48 = vld [vmem:[%s1165_s22 + $0xf0] sm:$0xff]  ;;  %v287_v49 = vld [vmem:[%s1165_s22 + $0x108] sm:$0xff] }
  0x67   : > { %663 = vmatpush1.bf16.xpose.msra.mxu0 %v662_v13  ;;  %737 = vmatpush1.bf16.xpose.msra.mxu1 %v662_v13  ;;  %v289_v50 = vld [vmem:[%s1165_s22 + $0x118] sm:$0xff]  ;;  %v686_v51 = vpack.c.bf16 %v284_v48, %v282_v47  ;;  %v286_v53 = vld [vmem:[%s1165_s22 + $0x100] sm:$0xff]  ;;  %v288_v54 = vld [vmem:[%s1165_s22 + $0x110] sm:$0xff] }
  0x68   : > { %665 = vmatprep.subr.bf16.mxu0 %v664_v14  ;;  %722 = vmatprep.subr.bf16.mxu1 %v664_v14  ;;  %v688_v52 = vpack.c.bf16 %v289_v50, %v287_v49  ;;  %v291_v55 = vld [vmem:[%s1165_s22 + $0x128] sm:$0xff]  ;;  %v293_v56 = vld [vmem:[%s1165_s22 + $0x138] sm:$0xff]  ;;  %v690_v57 = vpack.c.bf16 %v288_v54, %v286_v53  ;;  %v290_v59 = vld [vmem:[%s1165_s22 + $0x120] sm:$0xff] }
  0x69   : > { %v692_v58 = vpack.c.bf16 %v293_v56, %v291_v55  ;;  %v292_v60 = vld [vmem:[%s1165_s22 + $0x130] sm:$0xff]  ;;  %v295_v61 = vld [vmem:[%s1165_s22 + $0x148] sm:$0xff]  ;;  %v297_v62 = vld [vmem:[%s1165_s22 + $0x158] sm:$0xff] }
  0x6a   : > { %v694_v63 = vpack.c.bf16 %v292_v60, %v290_v59  ;;  %v696_v0 = vpack.c.bf16 %v297_v62, %v295_v61  ;;  %v294_v1 = vld [vmem:[%s1165_s22 + $0x140] sm:$0xff]  ;;  %v296_v2 = vld [vmem:[%s1165_s22 + $0x150] sm:$0xff]  ;;  %v299_v3 = vld [vmem:[%s1165_s22 + $0x168] sm:$0xff] }
  0x6b   : > { %v301_v4 = vld [vmem:[%s1165_s22 + $0x178] sm:$0xff]  ;;  %v698_v5 = vpack.c.bf16 %v296_v2, %v294_v1  ;;  %v298_v7 = vld [vmem:[%s1165_s22 + $0x160] sm:$0xff]  ;;  %v300_v8 = vld [vmem:[%s1165_s22 + $0x170] sm:$0xff] }
  0x6c   : > { %v700_v6 = vpack.c.bf16 %v301_v4, %v299_v3  ;;  %v303_v9 = vld [vmem:[%s1165_s22 + $0x188] sm:$0xff]  ;;  %v305_v10 = vld [vmem:[%s1165_s22 + $0x198] sm:$0xff]  ;;  %v702_v11 = vpack.c.bf16 %v300_v8, %v298_v7  ;;  %v302_v13 = vld [vmem:[%s1165_s22 + $0x180] sm:$0xff] }
  0x6d   : > { %v704_v12 = vpack.c.bf16 %v305_v10, %v303_v9  ;;  %v304_v14 = vld [vmem:[%s1165_s22 + $0x190] sm:$0xff]  ;;  %v307_v15 = vld [vmem:[%s1165_s22 + $0x1a8] sm:$0xff]  ;;  %v309_v16 = vld [vmem:[%s1165_s22 + $0x1b8] sm:$0xff] }
  0x6e   : > { %v706_v17 = vpack.c.bf16 %v304_v14, %v302_v13  ;;  %v708_v18 = vpack.c.bf16 %v309_v16, %v307_v15  ;;  %v311_v21 = vld [vmem:[%s1165_s22 + $0x1c8] sm:$0xff]  ;;  %v313_v22 = vld [vmem:[%s1165_s22 + $0x1d8] sm:$0xff]  ;;  %v310_v25 = vld [vmem:[%s1165_s22 + $0x1c0] sm:$0xff] }
  0x6f   : > { %667 = vmatpush1.bf16.xpose.msra.mxu0 %v666_v19  ;;  %738 = vmatpush1.bf16.xpose.msra.mxu1 %v666_v19  ;;  %v306_v19 = vld [vmem:[%s1165_s22 + $0x1a0] sm:$0xff]  ;;  %v712_v24 = vpack.c.bf16 %v313_v22, %v311_v21  ;;  %v312_v26 = vld [vmem:[%s1165_s22 + $0x1d0] sm:$0xff]  ;;  %v225_v36 = vld [vmem:[#allocation2 + $0x18] sm:$0xff] }
  0x70   : > { %669 = vmatprep.subr.bf16.mxu0 %v668_v20  ;;  %723 = vmatprep.subr.bf16.mxu1 %v668_v20  ;;  %v308_v20 = vld [vmem:[%s1165_s22 + $0x1b0] sm:$0xff]  ;;  %v714_v29 = vpack.c.bf16 %v312_v26, %v310_v25  ;;  %v314_v31 = vld [vmem:[%s1165_s22 + $0x1e0] sm:$0xff]  ;;  %v241_v37 = vld [vmem:[#allocation2 + $0x98] sm:$0xff] }
  0x71   : > { %v710_v23 = vpack.c.bf16 %v308_v20, %v306_v19  ;;  %v316_v32 = vld [vmem:[%s1165_s22 + $0x1f0] sm:$0xff]  ;;  %v238_v35 = vld [vmem:[#allocation2 + $0x80] sm:$0xff]  ;;  %v243_v41 = vld [vmem:[#allocation2 + $0xa8] sm:$0xff] }
  0x72   : > { %v224_v38 = vld [vmem:[#allocation2 + $0x10] sm:$0xff]  ;;  %v226_v42 = vld [vmem:[#allocation2 + $0x20] sm:$0xff]  ;;  %v229_v44 = vld [vmem:[#allocation2 + $0x38] sm:$0xff] }
  0x73   : > { %v242_v43 = vld [vmem:[#allocation2 + $0xa0] sm:$0xff]  ;;  %v244_v47 = vld [vmem:[#allocation2 + $0xb0] sm:$0xff]  ;;  %v231_v48 = vld [vmem:[#allocation2 + $0x48] sm:$0xff] }
  0x74   : > { %v247_v49 = vld [vmem:[#allocation2 + $0xc8] sm:$0xff]  ;;  %v230_v50 = vld [vmem:[#allocation2 + $0x40] sm:$0xff]  ;;  %v249_v53 = vld [vmem:[#allocation2 + $0xd8] sm:$0xff] }
  0x75   : > { %v232_v54 = vld [vmem:[#allocation2 + $0x50] sm:$0xff]  ;;  %v235_v56 = vld [vmem:[#allocation2 + $0x68] sm:$0xff]  ;;  %v250_v59 = vld [vmem:[#allocation2 + $0xe0] sm:$0xff] }
  0x76   : > { %v248_v55 = vld [vmem:[#allocation2 + $0xd0] sm:$0xff]  ;;  %v237_v60 = vld [vmem:[#allocation2 + $0x78] sm:$0xff] }
  0x77   : > { %671 = vmatpush1.bf16.xpose.msra.mxu0 %v670_v27  ;;  %739 = vmatpush1.bf16.xpose.msra.mxu1 %v670_v27  ;;  %v315_v27 = vld [vmem:[%s1165_s22 + $0x1e8] sm:$0xff]  ;;  %v253_v61 = vld [vmem:[#allocation2 + $0xf8] sm:$0xff]  ;;  %v236_v62 = vld [vmem:[#allocation2 + $0x70] sm:$0xff] }
  0x78   : > { %673 = vmatprep.subr.bf16.mxu0 %v672_v28  ;;  %724 = vmatprep.subr.bf16.mxu1 %v672_v28  ;;  %v317_v28 = vld [vmem:[%s1165_s22 + $0x1f8] sm:$0xff] }
  0x79   : > { %v716_v30 = vpack.c.bf16 %v317_v28, %v315_v27 }
  0x7f   : > { %675 = vmatpush1.bf16.xpose.msra.mxu0 %v674_v33  ;;  %740 = vmatpush1.bf16.xpose.msra.mxu1 %v674_v33  ;;  %v718_v33 = vpack.c.bf16 %v316_v32, %v314_v31 }
  0x80   : > { %677 = vmatprep.subr.bf16.mxu0 %v676_v34  ;;  %725 = vmatprep.subr.bf16.mxu1 %v676_v34  ;;  %v222_v34 = vld [vmem:[#allocation2] sm:$0xff] }
  0x87   : > { %679 = vmatpush1.bf16.xpose.msra.mxu0 %v678_v39  ;;  %741 = vmatpush1.bf16.xpose.msra.mxu1 %v678_v39  ;;  %v240_v39 = vld [vmem:[#allocation2 + $0x90] sm:$0xff] }
  0x88   : > { %681 = vmatprep.subr.bf16.mxu0 %v680_v40  ;;  %726 = vmatprep.subr.bf16.mxu1 %v680_v40  ;;  %v227_v40 = vld [vmem:[#allocation2 + $0x28] sm:$0xff] }
  0x8f   : > { %683 = vmatpush1.bf16.xpose.msra.mxu0 %v682_v45  ;;  %742 = vmatpush1.bf16.xpose.msra.mxu1 %v682_v45  ;;  %v245_v45 = vld [vmem:[#allocation2 + $0xb8] sm:$0xff] }
  0x90   : > { %685 = vmatprep.subr.bf16.mxu0 %v684_v46  ;;  %727 = vmatprep.subr.bf16.mxu1 %v684_v46  ;;  %v228_v46 = vld [vmem:[#allocation2 + $0x30] sm:$0xff] }
  0x97   : > { %687 = vmatpush1.bf16.xpose.msra.mxu0 %v686_v51  ;;  %743 = vmatpush1.bf16.xpose.msra.mxu1 %v686_v51  ;;  %v246_v51 = vld [vmem:[#allocation2 + $0xc0] sm:$0xff] }
  0x98   : > { %689 = vmatprep.subr.bf16.mxu0 %v688_v52  ;;  %728 = vmatprep.subr.bf16.mxu1 %v688_v52  ;;  %v233_v52 = vld [vmem:[#allocation2 + $0x58] sm:$0xff] }
  0x9f   : > { %691 = vmatpush1.bf16.xpose.msra.mxu0 %v690_v57  ;;  %744 = vmatpush1.bf16.xpose.msra.mxu1 %v690_v57  ;;  %v251_v57 = vld [vmem:[#allocation2 + $0xe8] sm:$0xff] }
  0xa0   : > { %693 = vmatprep.subr.bf16.mxu0 %v692_v58  ;;  %729 = vmatprep.subr.bf16.mxu1 %v692_v58  ;;  %v234_v58 = vld [vmem:[#allocation2 + $0x60] sm:$0xff] }
  0xa7   : > { %695 = vmatpush1.bf16.xpose.msra.mxu0 %v694_v63  ;;  %745 = vmatpush1.bf16.xpose.msra.mxu1 %v694_v63  ;;  %v252_v63 = vld [vmem:[#allocation2 + $0xf0] sm:$0xff] }
  0xa8   : > { %697 = vmatprep.subr.bf16.mxu0 %v696_v0  ;;  %730 = vmatprep.subr.bf16.mxu1 %v696_v0 }
  0xaf   : > { %699 = vmatpush1.bf16.xpose.msra.mxu0 %v698_v5  ;;  %746 = vmatpush1.bf16.xpose.msra.mxu1 %v698_v5 }
  0xb0   : > { %701 = vmatprep.subr.bf16.mxu0 %v700_v6  ;;  %731 = vmatprep.subr.bf16.mxu1 %v700_v6 }
  0xb7   : > { %703 = vmatpush1.bf16.xpose.msra.mxu0 %v702_v11  ;;  %747 = vmatpush1.bf16.xpose.msra.mxu1 %v702_v11 }
  0xb8   : > { %705 = vmatprep.subr.bf16.mxu0 %v704_v12  ;;  %732 = vmatprep.subr.bf16.mxu1 %v704_v12 }
  0xbf   : > { %707 = vmatpush1.bf16.xpose.msra.mxu0 %v706_v17  ;;  %748 = vmatpush1.bf16.xpose.msra.mxu1 %v706_v17 }
  0xc0   : > { %709 = vmatprep.subr.bf16.mxu0 %v708_v18  ;;  %733 = vmatprep.subr.bf16.mxu1 %v708_v18 }
  0xc7   : > { %711 = vmatpush1.bf16.xpose.msra.mxu0 %v710_v23  ;;  %749 = vmatpush1.bf16.xpose.msra.mxu1 %v710_v23 }
  0xc8   : > { %713 = vmatprep.subr.bf16.mxu0 %v712_v24  ;;  %734 = vmatprep.subr.bf16.mxu1 %v712_v24 }
  0xcf   : > { %715 = vmatpush1.bf16.xpose.msra.mxu0 %v714_v29  ;;  %750 = vmatpush1.bf16.xpose.msra.mxu1 %v714_v29 }
  0xd0   : > { %717 = vmatprep.subr.bf16.mxu0 %v716_v30  ;;  %735 = vmatprep.subr.bf16.mxu1 %v716_v30 }
  0xd7   : > { %719 = vmatpush1.bf16.xpose.msra.mxu0 %v718_v33  ;;  %751 = vmatpush1.bf16.xpose.msra.mxu1 %v718_v33 }
  0xde   : > { %383 = vmatmul.mubr.f32.vlgmr.msra.gmra.mrb[0].mxu0 %v222_v34  ;;  %431 = vmatmul.mubr.f32.vlgmr.msra.gmra.mrb[0].mxu1 %v238_v35 }
  0xdf   : > { %388 = vmatprep.mubr.f32.mxu0 %v225_v36  ;;  %436 = vmatprep.mubr.f32.mxu1 %v241_v37 }
  0xe2   : > { %389 = vmatmul.mubr.f32.gmra.mrb[2].mxu0 %v224_v38  ;;  %437 = vmatmul.mubr.f32.gmra.mrb[2].mxu1 %v240_v39 }
  0xe3   : > { %394 = vmatprep.mubr.f32.mxu0 %v227_v40  ;;  %442 = vmatprep.mubr.f32.mxu1 %v243_v41 }
  0xe6   : > { %395 = vmatmul.mubr.f32.gmra.mrb[4].mxu0 %v226_v42  ;;  %443 = vmatmul.mubr.f32.gmra.mrb[4].mxu1 %v242_v43 }
  0xe7   : > { %400 = vmatprep.mubr.f32.mxu0 %v229_v44  ;;  %448 = vmatprep.mubr.f32.mxu1 %v245_v45 }
  0xea   : > { %401 = vmatmul.mubr.f32.gmra.mrb[6].mxu0 %v228_v46  ;;  %449 = vmatmul.mubr.f32.gmra.mrb[6].mxu1 %v244_v47 }
  0xeb   : > { %406 = vmatprep.mubr.f32.mxu0 %v231_v48  ;;  %454 = vmatprep.mubr.f32.mxu1 %v247_v49 }
  0xee   : > { %407 = vmatmul.mubr.f32.gmra.mrb[8].mxu0 %v230_v50  ;;  %455 = vmatmul.mubr.f32.gmra.mrb[8].mxu1 %v246_v51 }
  0xef   : > { %412 = vmatprep.mubr.f32.mxu0 %v233_v52  ;;  %460 = vmatprep.mubr.f32.mxu1 %v249_v53 }
  0xf2   : > { %413 = vmatmul.mubr.f32.gmra.mrb[10].mxu0 %v232_v54  ;;  %461 = vmatmul.mubr.f32.gmra.mrb[10].mxu1 %v248_v55 }
  0xf3   : > { %418 = vmatprep.mubr.f32.mxu0 %v235_v56  ;;  %466 = vmatprep.mubr.f32.mxu1 %v251_v57 }
  0xf6   : > { %419 = vmatmul.mubr.f32.gmra.mrb[12].mxu0 %v234_v58  ;;  %467 = vmatmul.mubr.f32.gmra.mrb[12].mxu1 %v250_v59 }
  0xf7   : > { %424 = vmatprep.mubr.f32.mxu0 %v237_v60  ;;  %472 = vmatprep.mubr.f32.mxu1 %v253_v61 }
  0xfa   : > { %425 = vmatmul.mubr.f32.gmra.mrb[14].mxu0 %v236_v62  ;;  %473 = vmatmul.mubr.f32.gmra.mrb[14].mxu1 %v252_v63 }
 0x1b1   : > { %v384_v0 = vpop.f32.mrb[0].mxu0  ;;  %v432_v1 = vpop.f32.mrb[0].mxu1 }
 0x1b2   : > { %479 = vst [vmem:[%s1236_s19] sm:$0xff] %v384_v0  ;;  %495 = vst [vmem:[%s1236_s19 + $0x80] sm:$0xff] %v432_v1  ;;  %v386_v2 = vpop.f32.mrb[1].mxu0  ;;  %v434_v3 = vpop.f32.mrb[1].mxu1 }
 0x1b3   : > { %480 = vst [vmem:[%s1236_s19 + $0x8] sm:$0xff] %v386_v2  ;;  %496 = vst [vmem:[%s1236_s19 + $0x88] sm:$0xff] %v434_v3 }
 0x1b5   : > { %v390_v4 = vpop.f32.mrb[2].mxu0  ;;  %v438_v5 = vpop.f32.mrb[2].mxu1 }
 0x1b6   : > { %481 = vst [vmem:[%s1236_s19 + $0x10] sm:$0xff] %v390_v4  ;;  %497 = vst [vmem:[%s1236_s19 + $0x90] sm:$0xff] %v438_v5  ;;  %v392_v6 = vpop.f32.mrb[3].mxu0  ;;  %v440_v7 = vpop.f32.mrb[3].mxu1 }
 0x1b7   : > { %482 = vst [vmem:[%s1236_s19 + $0x18] sm:$0xff] %v392_v6  ;;  %498 = vst [vmem:[%s1236_s19 + $0x98] sm:$0xff] %v440_v7 }
 0x1b9   : > { %v396_v8 = vpop.f32.mrb[4].mxu0  ;;  %v444_v9 = vpop.f32.mrb[4].mxu1 }
 0x1ba   : > { %483 = vst [vmem:[%s1236_s19 + $0x20] sm:$0xff] %v396_v8  ;;  %499 = vst [vmem:[%s1236_s19 + $0xa0] sm:$0xff] %v444_v9  ;;  %v398_v10 = vpop.f32.mrb[5].mxu0  ;;  %v446_v11 = vpop.f32.mrb[5].mxu1 }
 0x1bb   : > { %484 = vst [vmem:[%s1236_s19 + $0x28] sm:$0xff] %v398_v10  ;;  %500 = vst [vmem:[%s1236_s19 + $0xa8] sm:$0xff] %v446_v11 }
 0x1bd   : > { %v402_v12 = vpop.f32.mrb[6].mxu0  ;;  %v450_v13 = vpop.f32.mrb[6].mxu1 }
 0x1be   : > { %485 = vst [vmem:[%s1236_s19 + $0x30] sm:$0xff] %v402_v12  ;;  %501 = vst [vmem:[%s1236_s19 + $0xb0] sm:$0xff] %v450_v13  ;;  %v404_v14 = vpop.f32.mrb[7].mxu0  ;;  %v452_v15 = vpop.f32.mrb[7].mxu1 }
 0x1bf   : > { %486 = vst [vmem:[%s1236_s19 + $0x38] sm:$0xff] %v404_v14  ;;  %502 = vst [vmem:[%s1236_s19 + $0xb8] sm:$0xff] %v452_v15 }
 0x1c1   : > { %v408_v16 = vpop.f32.mrb[8].mxu0  ;;  %v456_v17 = vpop.f32.mrb[8].mxu1 }
 0x1c2   : > { %487 = vst [vmem:[%s1236_s19 + $0x40] sm:$0xff] %v408_v16  ;;  %503 = vst [vmem:[%s1236_s19 + $0xc0] sm:$0xff] %v456_v17  ;;  %v410_v18 = vpop.f32.mrb[9].mxu0  ;;  %v458_v19 = vpop.f32.mrb[9].mxu1 }
 0x1c3   : > { %488 = vst [vmem:[%s1236_s19 + $0x48] sm:$0xff] %v410_v18  ;;  %504 = vst [vmem:[%s1236_s19 + $0xc8] sm:$0xff] %v458_v19 }
 0x1c5   : > { %v414_v20 = vpop.f32.mrb[10].mxu0  ;;  %v462_v21 = vpop.f32.mrb[10].mxu1 }
 0x1c6   : > { %489 = vst [vmem:[%s1236_s19 + $0x50] sm:$0xff] %v414_v20  ;;  %505 = vst [vmem:[%s1236_s19 + $0xd0] sm:$0xff] %v462_v21  ;;  %v416_v22 = vpop.f32.mrb[11].mxu0  ;;  %v464_v23 = vpop.f32.mrb[11].mxu1 }
 0x1c7   : > { %490 = vst [vmem:[%s1236_s19 + $0x58] sm:$0xff] %v416_v22  ;;  %506 = vst [vmem:[%s1236_s19 + $0xd8] sm:$0xff] %v464_v23 }
 0x1c9   : > { %v420_v24 = vpop.f32.mrb[12].mxu0  ;;  %v468_v25 = vpop.f32.mrb[12].mxu1 }
 0x1ca   : > { %491 = vst [vmem:[%s1236_s19 + $0x60] sm:$0xff] %v420_v24  ;;  %507 = vst [vmem:[%s1236_s19 + $0xe0] sm:$0xff] %v468_v25  ;;  %v422_v26 = vpop.f32.mrb[13].mxu0  ;;  %v470_v27 = vpop.f32.mrb[13].mxu1 }
 0x1cb   : > { %492 = vst [vmem:[%s1236_s19 + $0x68] sm:$0xff] %v422_v26  ;;  %508 = vst [vmem:[%s1236_s19 + $0xe8] sm:$0xff] %v470_v27 }
 0x1cd   : > { %v426_v28 = vpop.f32.mrb[14].mxu0  ;;  %v474_v29 = vpop.f32.mrb[14].mxu1 }
 0x1ce   : > { %493 = vst [vmem:[%s1236_s19 + $0x70] sm:$0xff] %v426_v28  ;;  %509 = vst [vmem:[%s1236_s19 + $0xf0] sm:$0xff] %v474_v29  ;;  %v428_v30 = vpop.f32.mrb[15].mxu0  ;;  %v476_v31 = vpop.f32.mrb[15].mxu1 }
 0x1cf   : > { %494 = vst [vmem:[%s1236_s19 + $0x78] sm:$0xff] %v428_v30  ;;  %510 = vst [vmem:[%s1236_s19 + $0xf8] sm:$0xff] %v476_v31 }
 0x1d0   : > { %901 = shalt.err (!%p898_p5)
}
 0x1d1   : > { %s902_s3 = scalar_lea.hbm %s1271_s5, 4096  ;;  %s906_s8 = scalar_lea.hbm %s1328_s2, 8192 }
 0x1d2   : > { %p903_p9 = scmp.ne.s32.totalorder %s1271_s5, %s902_s3  ;;  %p907_p3 = scmp.lt.u32.totalorder %s1271_s5, %s1328_s2 }
 0x1d3   : > { %p908_p7 = scmp.lt.u32.totalorder %s906_s8, %s902_s3  ;;  %p910_p4 = scmp.lt.u32.totalorder %s902_s3, %s1271_s5 }
 0x1d4   : > { %p904_p1 = pnand %p903_p9, %p1098_p10 }
 0x1d5   : > { %p909_p13 = por %p908_p7, %p907_p3 }
 0x1d6   : > { %p905_p2 = pneg %p904_p1 }
 0x1d7   : > { %p911_p6 = por %p910_p4, %p909_p13 }
 0x1d9   : > { %p912_p8 = pnand %p911_p6, %p905_p2 }
 0x1db   : > { %915 = shalt.err (!%p912_p8)
}
 0x1dc   : > { %s981_s17 = smov 256   ;;  %s982_s19 = smov 512  }
 0x1dd   : > { %s983_s21 = smov 16  }
 0x1de   : > { %758 = dma.vmem_to_hbm [thread:$0]  (%p1098_p10), %s1273_s6, 4096, %s1271_s5, %s512_s12, %s981_s17, %s982_s19, %s983_s21  }
 0x1df PF: > { %s543_s7 = sand.u32 1, %s954_s9   ;;  %p1346_p12 = scmp.ne.s32.totalorder %s1336_s20, 0 }
 0x1e0   : > { %p1347_p11 = scmp.ge.s32.totalorder %s974_s14, 2  ;;  %s544_s4 = scalar_lea.sflag [#allocation4], %s543_s7 }
 0x1e2   : > { %p769_p0 = pnand %p1347_p11, %p1346_p12 }
 0x1e4   : > { %949 = dma.done.wait (!%p769_p0), %s544_s4, 4096  }
 0x1e5   : > { %951 = vsyncadd (!%p769_p0), %s544_s4, 4294963200  ;;  %s19_s14 = sadd.s32 1, %s974_s14   ;;  %s1348_s9 = smov %s958_s10 }
 0x1e6   : > { %p16_p5 = scmp.ge.s32.totalorder %s19_s14, 4   ;;  %s1349_s10 = smov %s962_s11 }
 0x1e7   : > { %s1350_s11 = smov %s1107_s28  ;;  %s1351_s12 = smov %s970_s13 }
 0x1e8   : > { %s1352_s13 = smov %s1354_s25  ;;  %18 = sbr.rel (!%p16_p5) target bundleno = 7 (0x7), region = 79 }
 0x1ef   :  { %549 = vsyncpa [#allocation3], 1 }
 0x1f0   :  { %551 = vsyncpa [#allocation3 + $0x1], 1 }
 0x1f1   :  { %552 = vsyncpa [#allocation6], 1 }
 0x1f2   :  { %554 = vsyncpa [#allocation6 + $0x1], 1 }
 0x1f3   :  { %555 = vsyncpa [#allocation4], 1 }
 0x1f4   :  { %557 = vsyncpa [#allocation4 + $0x1], 1 }

</bundles_post_ra>
